<compile_context>
chip_gen: v5e
topology: v5e:2x2
jax: 0.10.0
libtpu: 0.0.40
codegen_flags: <defaults>
</compile_context>

<pallas_src>
import functools

import jax
import jax.numpy as jnp
import numpy as np
from jax import lax
from jax.experimental import pallas as pl
from jax.experimental.pallas import tpu as pltpu


# ---------------------------------------------------------------------------
# Pallas kernel: fused upsample + conv3x3(pad=1) + folded BN affine + ReLU
# ---------------------------------------------------------------------------
def _upde_kernel(nimg, cout, hs, ws, hp,
                 x_ref, rh_ref, g_ref, shift_ref, o_ref, xh_scr, y_scr):
    # x_ref     : (N*H,  Cin*W)        raw input, rows=(n,h), lanes=(c,w)
    # rh_ref    : (N*Hp, N*H)          height upsample + vertical zero-pad operator
    # g_ref     : (3, Cin*W, Cout*Ws)  per-vertical-tap folded operator
    # shift_ref : (1, Cout*Ws)         folded conv bias + BN shift (f32)
    # o_ref     : (N, Cout, Hs, Ws)    dense NCHW output
    # xh_scr    : (N*Hp, Cin*W)        VMEM scratch (compute dtype)
    # y_scr     : (N*Hp - 2, Cout*Ws)  VMEM scratch (f32)
    f32 = jnp.float32

    # 1) Height upsample + vertical zero pad for every (image, channel, col)
    #    in one MXU matmul; rows become the padded, upsampled image rows.
    xh = jnp.dot(rh_ref[...], x_ref[...], preferred_element_type=f32)
    xh_scr[...] = xh.astype(xh_scr.dtype)

    out_rows = (nimg - 1) * hp + hs          # valid rows + inter-image junk rows

    # 2) Conv 3x3: one matmul per vertical tap ky.  The width upsample, the
    #    horizontal zero pad, the three horizontal taps and the BN scale are
    #    all folded into g_ref[ky]; the ky shift is a sublane-offset read.
    acc = jnp.zeros((out_rows, cout * ws), f32)
    for ky in range(3):
        lhs = xh_scr[pl.ds(ky, out_rows), :]
        acc = acc + jnp.dot(lhs, g_ref[ky], preferred_element_type=f32)

    # 3) Folded conv-bias + BN shift, then ReLU (f32 epilogue).
    y_scr[...] = jnp.maximum(acc + shift_ref[...], 0.0)

    # 4) Crop the per-image pad/junk rows and store dense NCHW directly
    #    (no wrapper-side crop pass).
    for b in range(nimg):
        for o in range(cout):
            o_ref[b, o] = y_scr[pl.ds(b * hp, hs),
                                pl.ds(o * ws, ws)].astype(o_ref.dtype)


# ---------------------------------------------------------------------------
# Wrapper: builds the folded operators and calls the kernel
# ---------------------------------------------------------------------------
def _upsample_matrix(in_size, scale, mode):
    """(out, in) interpolation matrix matching torch.nn.Upsample semantics."""
    out_size = in_size * scale
    m = np.zeros((out_size, in_size), np.float32)
    if mode == "nearest":
        for o in range(out_size):
            m[o, o // scale] = 1.0
    elif mode == "bilinear":
        # torch default: align_corners=False, half-pixel centers.
        for o in range(out_size):
            src = max((o + 0.5) / scale - 0.5, 0.0)
            i0 = min(int(np.floor(src)), in_size - 1)
            i1 = min(i0 + 1, in_size - 1)
            lam = src - i0
            m[o, i0] += 1.0 - lam
            m[o, i1] += lam
    else:
        raise ValueError(f"unsupported mode: {mode}")
    return m


def upde_forward(x_nchw, params, *, scale, mode, compute_dtype=jnp.bfloat16):
    # compute_dtype=bf16 by default (MXU bf16 path, halved DMA); accumulation
    # and the epilogue stay f32.  Pass jnp.float32 for strict-accuracy use.
    conv_w, conv_b, gamma, beta, run_mean, run_var, eps = params
    n, cin, h, win = x_nchw.shape
    cout = conv_w.shape[0]
    assert int(scale) == scale and scale >= 1, "integer scale_factor expected"
    scale = int(scale)
    hs, ws = h * scale, win * scale
    hp = hs + 2                       # one zero-pad row above and below each image

    # ---- fold the (linear, separable) upsample + conv pad into operators ----
    up_h = _upsample_matrix(h, scale, mode)          # (hs, h)
    up_w = _upsample_matrix(win, scale, mode)        # (ws, win)

    rh_pad = np.zeros((hp, h), np.float32)           # height op incl. vertical pad
    rh_pad[1:1 + hs] = up_h
    rh_big = np.kron(np.eye(n, dtype=np.float32), rh_pad)        # (n*hp, n*h)

    rw_pad = np.zeros((win, ws + 2), np.float32)     # width op incl. horizontal pad
    rw_pad[:, 1:1 + ws] = up_w.T
    # b_taps[w, j, kx] = rw_pad[w, j + kx] : horizontal-tap-shifted width operator
    b_taps = np.stack([rw_pad[:, kx:kx + ws] for kx in range(3)], axis=-1)

    # BatchNorm (inference) + conv bias folded into conv weights / shift:
    #   relu(((conv(xu) + b) - mean) * gamma/sqrt(var+eps) + beta)
    scale_v = gamma / jnp.sqrt(run_var + eps)                    # (cout,)
    wf = conv_w * scale_v[:, None, None, None]                   # (cout, cin, 3, 3)
    shift_v = beta + (conv_b - run_mean) * scale_v               # (cout,)

    # g[ky][c*W + w, o*Ws + j] = sum_kx wf[o,c,ky,kx] * rw_pad[w, j+kx]
    b_j = jnp.asarray(b_taps)
    g = jnp.stack([
        jnp.einsum("ocx,wjx->cwoj", wf[:, :, ky, :], b_j)
        .reshape(cin * win, cout * ws)
        for ky in range(3)
    ]).astype(compute_dtype)                                     # (3, cin*W, cout*Ws)

    rh = jnp.asarray(rh_big).astype(compute_dtype)               # (n*hp, n*h)
    shift2 = jnp.repeat(shift_v, ws).reshape(1, cout * ws).astype(jnp.float32)

    # Raw input, rows=(n, h), lanes=(c, w): the only image tensor read from HBM.
    x0 = jnp.transpose(x_nchw, (0, 2, 1, 3)).reshape(n * h, cin * win)
    x0 = x0.astype(compute_dtype)

    out_rows = (n - 1) * hp + hs
    kernel = functools.partial(_upde_kernel, n, cout, hs, ws, hp)
    return pl.pallas_call(
        kernel,
        out_shape=jax.ShapeDtypeStruct((n, cout, hs, ws), x_nchw.dtype),
        grid=(1,),                    # batch merged into the single block
        in_specs=[
            pl.BlockSpec((n * h, cin * win), lambda i: (0, 0)),
            pl.BlockSpec((n * hp, n * h), lambda i: (0, 0)),
            pl.BlockSpec((3, cin * win, cout * ws), lambda i: (0, 0, 0)),
            pl.BlockSpec((1, cout * ws), lambda i: (0, 0)),
        ],
        out_specs=pl.BlockSpec((n, cout, hs, ws), lambda i: (0, 0, 0, 0)),
        scratch_shapes=[
            pltpu.VMEM((n * hp, cin * win), compute_dtype),
            pltpu.VMEM((out_rows, cout * ws), jnp.float32),
        ],
        compiler_params=pltpu.CompilerParams(
            dimension_semantics=("arbitrary",)),
    )(x0, rh, g, shift2)


# ---------------------------------------------------------------------------
# Pure-JAX reference (independent path, for validation)
# ---------------------------------------------------------------------------
def upde_reference(x_nchw, params, *, scale, mode):
    conv_w, conv_b, gamma, beta, run_mean, run_var, eps = params
    n, cin, h, win = x_nchw.shape
    if mode == "nearest":
        xu = jnp.repeat(jnp.repeat(x_nchw, scale, axis=2), scale, axis=3)
    else:
        xu = jax.image.resize(
            x_nchw, (n, cin, h * scale, win * scale), method="bilinear")
    y = lax.conv_general_dilated(
        xu, conv_w, window_strides=(1, 1), padding=((1, 1), (1, 1)),
        dimension_numbers=("NCHW", "OIHW", "NCHW"))
    y = y + conv_b.reshape(1, -1, 1, 1)
    y = (y - run_mean.reshape(1, -1, 1, 1)) / jnp.sqrt(
        run_var.reshape(1, -1, 1, 1) + eps)
    y = y * gamma.reshape(1, -1, 1, 1) + beta.reshape(1, -1, 1, 1)
    return jnp.maximum(y, 0.0)


# ---------------------------------------------------------------------------
if __name__ == "__main__":
    # Small shapes consistent with the module: N=2, in_channels=4, 16x16 input,
    # cat_channels=8, scale=2 (UNet3+ decoder convention).
    N, CIN, COUT, H, W = 2, 4, 8, 16, 16
    SCALE, EPS = 2, 1e-5

    key = jax.random.PRNGKey(0)
    kx, kw, kb, kg, kbe, km, kv = jax.random.split(key, 7)

    x = jax.random.normal(kx, (N, CIN, H, W), jnp.float32)
    conv_w = 0.1 * jax.random.normal(kw, (COUT, CIN, 3, 3), jnp.float32)
    conv_b = 0.1 * jax.random.normal(kb, (COUT,), jnp.float32)
    bn_gamma = 1.0 + 0.1 * jax.random.normal(kg, (COUT,), jnp.float32)
    bn_beta = 0.1 * jax.random.normal(kbe, (COUT,), jnp.float32)
    bn_mean = 0.1 * jax.random.normal(km, (COUT,), jnp.float32)
    bn_var = 1.0 + 0.1 * jax.random.uniform(kv, (COUT,), jnp.float32)
    params = (conv_w, conv_b, bn_gamma, bn_beta, bn_mean, bn_var, EPS)

    configs = (
        ("bilinear", jnp.bfloat16, 5e-2, 5e-2),   # default fast path
        ("bilinear", jnp.float32, 1e-3, 1e-3),    # strict-accuracy path
        ("nearest",  jnp.bfloat16, 5e-2, 5e-2),
    )
    for mode, cd, rtol, atol in configs:
        out = upde_forward(x, params, scale=SCALE, mode=mode, compute_dtype=cd)
        out = jax.block_until_ready(out)
        ref = upde_reference(x, params, scale=SCALE, mode=mode)
        assert out.shape == (N, COUT, H * SCALE, W * SCALE), out.shape
        max_err = float(jnp.max(jnp.abs(out - ref)))
        assert jnp.allclose(out, ref, rtol=rtol, atol=atol), (mode, str(cd), max_err)

    print("KERNEL_OK")
</pallas_src>

<mosaic_0001>
module attributes {stable_mosaic.version = 11 : i64} {
  func.func @_upde_kernel(%arg0: i32, %arg1: memref<32x64xbf16, #tpu.memory_space<vmem>>, %arg2: memref<68x32xbf16, #tpu.memory_space<vmem>>, %arg3: memref<3x64x256xbf16, #tpu.memory_space<vmem>>, %arg4: memref<1x256xf32, #tpu.memory_space<vmem>>, %arg5: memref<2x8x32x32xf32, #tpu.memory_space<vmem>>, %arg6: memref<68x64xbf16, #tpu.memory_space<vmem>>, %arg7: memref<66x256xf32, #tpu.memory_space<vmem>>) attributes {dimension_semantics = [#tpu.dimension_semantics<arbitrary>], iteration_bounds = array<i64: 1>, scalar_prefetch = 0 : i64, scratch_operands = 2 : i64, tpu.core_type = #tpu.core_type<tc>, window_params = [{pipeline_mode = #tpu.pipeline_mode<synchronous>, transform_indices = @transform_0, window_bounds = array<i64: 32, 64>}, {pipeline_mode = #tpu.pipeline_mode<synchronous>, transform_indices = @transform_1, window_bounds = array<i64: 68, 32>}, {pipeline_mode = #tpu.pipeline_mode<synchronous>, transform_indices = @transform_2, window_bounds = array<i64: 3, 64, 256>}, {pipeline_mode = #tpu.pipeline_mode<synchronous>, transform_indices = @transform_3, window_bounds = array<i64: 1, 256>}, {pipeline_mode = #tpu.pipeline_mode<synchronous>, transform_indices = @transform_4, window_bounds = array<i64: 2, 8, 32, 32>}]} {
    %c0 = arith.constant 0 : index
    %c0_0 = arith.constant 0 : index
    %0 = vector.load %arg2[%c0, %c0_0] : memref<68x32xbf16, #tpu.memory_space<vmem>>, vector<68x32xbf16>
    %c0_1 = arith.constant 0 : index
    %c0_2 = arith.constant 0 : index
    %1 = vector.load %arg1[%c0_1, %c0_2] : memref<32x64xbf16, #tpu.memory_space<vmem>>, vector<32x64xbf16>
    %cst = arith.constant dense<0.000000e+00> : vector<68x64xf32>
    %2 = tpu.matmul %0, %1, %cst {dimension_numbers = #tpu.dot_dimension_numbers<[1], [0], [0], [1], [0, 0, 1, 1], [], []>} : vector<68x32xbf16>, vector<32x64xbf16>, vector<68x64xf32> -> vector<68x64xf32>
    %3 = arith.truncf %2 : vector<68x64xf32> to vector<68x64xbf16>
    %c0_3 = arith.constant 0 : index
    %c0_4 = arith.constant 0 : index
    %4 = vector.load %arg6[%c0_3, %c0_4] : memref<68x64xbf16, #tpu.memory_space<vmem>>, vector<68x64xbf16>
    tpu.vector_store %arg6[%c0_3, %c0_4], %3 {strides = array<i32>} : memref<68x64xbf16, #tpu.memory_space<vmem>>, vector<68x64xbf16>,
    %cst_5 = arith.constant 0.000000e+00 : f32
    %5 = vector.broadcast %cst_5 : f32 to vector<66x256xf32>
    %c0_6 = arith.constant 0 : index
    %c0_7 = arith.constant 0 : index
    %6 = vector.load %arg6[%c0_6, %c0_7] : memref<68x64xbf16, #tpu.memory_space<vmem>>, vector<66x64xbf16>
    %c0_8 = arith.constant 0 : index
    %c0_9 = arith.constant 0 : index
    %c0_10 = arith.constant 0 : index
    %7 = vector.load %arg3[%c0_8, %c0_9, %c0_10] : memref<3x64x256xbf16, #tpu.memory_space<vmem>>, vector<1x64x256xbf16>
    %8 = vector.shape_cast %7 : vector<1x64x256xbf16> to vector<64x256xbf16>
    %cst_11 = arith.constant dense<0.000000e+00> : vector<66x256xf32>
    %9 = tpu.matmul %6, %8, %cst_11 {dimension_numbers = #tpu.dot_dimension_numbers<[1], [0], [0], [1], [0, 0, 1, 1], [], []>} : vector<66x64xbf16>, vector<64x256xbf16>, vector<66x256xf32> -> vector<66x256xf32>
    %10 = arith.addf %5, %9 : vector<66x256xf32>
    %c1 = arith.constant 1 : index
    %c0_12 = arith.constant 0 : index
    %11 = vector.load %arg6[%c1, %c0_12] : memref<68x64xbf16, #tpu.memory_space<vmem>>, vector<66x64xbf16>
    %c1_13 = arith.constant 1 : index
    %c0_14 = arith.constant 0 : index
    %c0_15 = arith.constant 0 : index
    %12 = vector.load %arg3[%c1_13, %c0_14, %c0_15] : memref<3x64x256xbf16, #tpu.memory_space<vmem>>, vector<1x64x256xbf16>
    %13 = vector.shape_cast %12 : vector<1x64x256xbf16> to vector<64x256xbf16>
    %cst_16 = arith.constant dense<0.000000e+00> : vector<66x256xf32>
    %14 = tpu.matmul %11, %13, %cst_16 {dimension_numbers = #tpu.dot_dimension_numbers<[1], [0], [0], [1], [0, 0, 1, 1], [], []>} : vector<66x64xbf16>, vector<64x256xbf16>, vector<66x256xf32> -> vector<66x256xf32>
    %15 = arith.addf %10, %14 : vector<66x256xf32>
    %c2 = arith.constant 2 : index
    %c0_17 = arith.constant 0 : index
    %16 = vector.load %arg6[%c2, %c0_17] : memref<68x64xbf16, #tpu.memory_space<vmem>>, vector<66x64xbf16>
    %c2_18 = arith.constant 2 : index
    %c0_19 = arith.constant 0 : index
    %c0_20 = arith.constant 0 : index
    %17 = vector.load %arg3[%c2_18, %c0_19, %c0_20] : memref<3x64x256xbf16, #tpu.memory_space<vmem>>, vector<1x64x256xbf16>
    %18 = vector.shape_cast %17 : vector<1x64x256xbf16> to vector<64x256xbf16>
    %cst_21 = arith.constant dense<0.000000e+00> : vector<66x256xf32>
    %19 = tpu.matmul %16, %18, %cst_21 {dimension_numbers = #tpu.dot_dimension_numbers<[1], [0], [0], [1], [0, 0, 1, 1], [], []>} : vector<66x64xbf16>, vector<64x256xbf16>, vector<66x256xf32> -> vector<66x256xf32>
    %20 = arith.addf %15, %19 : vector<66x256xf32>
    %c0_22 = arith.constant 0 : index
    %c0_23 = arith.constant 0 : index
    %21 = vector.load %arg4[%c0_22, %c0_23] : memref<1x256xf32, #tpu.memory_space<vmem>>, vector<1x256xf32>
    %22 = vector.broadcast %21 : vector<1x256xf32> to vector<66x256xf32>
    %23 = arith.addf %20, %22 : vector<66x256xf32>
    %cst_24 = arith.constant 0.000000e+00 : f32
    %24 = vector.broadcast %cst_24 : f32 to vector<66x256xf32>
    %25 = arith.maximumf %23, %24 : vector<66x256xf32>
    %c0_25 = arith.constant 0 : index
    %c0_26 = arith.constant 0 : index
    %26 = vector.load %arg7[%c0_25, %c0_26] : memref<66x256xf32, #tpu.memory_space<vmem>>, vector<66x256xf32>
    tpu.vector_store %arg7[%c0_25, %c0_26], %25 {strides = array<i32>} : memref<66x256xf32, #tpu.memory_space<vmem>>, vector<66x256xf32>,
    %c0_27 = arith.constant 0 : index
    %c0_28 = arith.constant 0 : index
    %27 = vector.load %arg7[%c0_27, %c0_28] : memref<66x256xf32, #tpu.memory_space<vmem>>, vector<32x32xf32>
    %c0_29 = arith.constant 0 : index
    %c0_30 = arith.constant 0 : index
    %c0_31 = arith.constant 0 : index
    %c0_32 = arith.constant 0 : index
    %28 = vector.load %arg5[%c0_29, %c0_30, %c0_31, %c0_32] : memref<2x8x32x32xf32, #tpu.memory_space<vmem>>, vector<1x1x32x32xf32>
    %29 = vector.shape_cast %28 : vector<1x1x32x32xf32> to vector<32x32xf32>
    %30 = vector.shape_cast %27 : vector<32x32xf32> to vector<1x1x32x32xf32>
    tpu.vector_store %arg5[%c0_29, %c0_30, %c0_31, %c0_32], %30 {strides = array<i32>} : memref<2x8x32x32xf32, #tpu.memory_space<vmem>>, vector<1x1x32x32xf32>,
    %c0_33 = arith.constant 0 : index
    %c32 = arith.constant 32 : index
    %31 = vector.load %arg7[%c0_33, %c32] : memref<66x256xf32, #tpu.memory_space<vmem>>, vector<32x32xf32>
    %c0_34 = arith.constant 0 : index
    %c1_35 = arith.constant 1 : index
    %c0_36 = arith.constant 0 : index
    %c0_37 = arith.constant 0 : index
    %32 = vector.load %arg5[%c0_34, %c1_35, %c0_36, %c0_37] : memref<2x8x32x32xf32, #tpu.memory_space<vmem>>, vector<1x1x32x32xf32>
    %33 = vector.shape_cast %32 : vector<1x1x32x32xf32> to vector<32x32xf32>
    %34 = vector.shape_cast %31 : vector<32x32xf32> to vector<1x1x32x32xf32>
    tpu.vector_store %arg5[%c0_34, %c1_35, %c0_36, %c0_37], %34 {strides = array<i32>} : memref<2x8x32x32xf32, #tpu.memory_space<vmem>>, vector<1x1x32x32xf32>,
    %c0_38 = arith.constant 0 : index
    %c64 = arith.constant 64 : index
    %35 = vector.load %arg7[%c0_38, %c64] : memref<66x256xf32, #tpu.memory_space<vmem>>, vector<32x32xf32>
    %c0_39 = arith.constant 0 : index
    %c2_40 = arith.constant 2 : index
    %c0_41 = arith.constant 0 : index
    %c0_42 = arith.constant 0 : index
    %36 = vector.load %arg5[%c0_39, %c2_40, %c0_41, %c0_42] : memref<2x8x32x32xf32, #tpu.memory_space<vmem>>, vector<1x1x32x32xf32>
    %37 = vector.shape_cast %36 : vector<1x1x32x32xf32> to vector<32x32xf32>
    %38 = vector.shape_cast %35 : vector<32x32xf32> to vector<1x1x32x32xf32>
    tpu.vector_store %arg5[%c0_39, %c2_40, %c0_41, %c0_42], %38 {strides = array<i32>} : memref<2x8x32x32xf32, #tpu.memory_space<vmem>>, vector<1x1x32x32xf32>,
    %c0_43 = arith.constant 0 : index
    %c96 = arith.constant 96 : index
    %39 = vector.load %arg7[%c0_43, %c96] : memref<66x256xf32, #tpu.memory_space<vmem>>, vector<32x32xf32>
    %c0_44 = arith.constant 0 : index
    %c3 = arith.constant 3 : index
    %c0_45 = arith.constant 0 : index
    %c0_46 = arith.constant 0 : index
    %40 = vector.load %arg5[%c0_44, %c3, %c0_45, %c0_46] : memref<2x8x32x32xf32, #tpu.memory_space<vmem>>, vector<1x1x32x32xf32>
    %41 = vector.shape_cast %40 : vector<1x1x32x32xf32> to vector<32x32xf32>
    %42 = vector.shape_cast %39 : vector<32x32xf32> to vector<1x1x32x32xf32>
    tpu.vector_store %arg5[%c0_44, %c3, %c0_45, %c0_46], %42 {strides = array<i32>} : memref<2x8x32x32xf32, #tpu.memory_space<vmem>>, vector<1x1x32x32xf32>,
    %c0_47 = arith.constant 0 : index
    %c128 = arith.constant 128 : index
    %43 = vector.load %arg7[%c0_47, %c128] : memref<66x256xf32, #tpu.memory_space<vmem>>, vector<32x32xf32>
    %c0_48 = arith.constant 0 : index
    %c4 = arith.constant 4 : index
    %c0_49 = arith.constant 0 : index
    %c0_50 = arith.constant 0 : index
    %44 = vector.load %arg5[%c0_48, %c4, %c0_49, %c0_50] : memref<2x8x32x32xf32, #tpu.memory_space<vmem>>, vector<1x1x32x32xf32>
    %45 = vector.shape_cast %44 : vector<1x1x32x32xf32> to vector<32x32xf32>
    %46 = vector.shape_cast %43 : vector<32x32xf32> to vector<1x1x32x32xf32>
    tpu.vector_store %arg5[%c0_48, %c4, %c0_49, %c0_50], %46 {strides = array<i32>} : memref<2x8x32x32xf32, #tpu.memory_space<vmem>>, vector<1x1x32x32xf32>,
    %c0_51 = arith.constant 0 : index
    %c160 = arith.constant 160 : index
    %47 = vector.load %arg7[%c0_51, %c160] : memref<66x256xf32, #tpu.memory_space<vmem>>, vector<32x32xf32>
    %c0_52 = arith.constant 0 : index
    %c5 = arith.constant 5 : index
    %c0_53 = arith.constant 0 : index
    %c0_54 = arith.constant 0 : index
    %48 = vector.load %arg5[%c0_52, %c5, %c0_53, %c0_54] : memref<2x8x32x32xf32, #tpu.memory_space<vmem>>, vector<1x1x32x32xf32>
    %49 = vector.shape_cast %48 : vector<1x1x32x32xf32> to vector<32x32xf32>
    %50 = vector.shape_cast %47 : vector<32x32xf32> to vector<1x1x32x32xf32>
    tpu.vector_store %arg5[%c0_52, %c5, %c0_53, %c0_54], %50 {strides = array<i32>} : memref<2x8x32x32xf32, #tpu.memory_space<vmem>>, vector<1x1x32x32xf32>,
    %c0_55 = arith.constant 0 : index
    %c192 = arith.constant 192 : index
    %51 = vector.load %arg7[%c0_55, %c192] : memref<66x256xf32, #tpu.memory_space<vmem>>, vector<32x32xf32>
    %c0_56 = arith.constant 0 : index
    %c6 = arith.constant 6 : index
    %c0_57 = arith.constant 0 : index
    %c0_58 = arith.constant 0 : index
    %52 = vector.load %arg5[%c0_56, %c6, %c0_57, %c0_58] : memref<2x8x32x32xf32, #tpu.memory_space<vmem>>, vector<1x1x32x32xf32>
    %53 = vector.shape_cast %52 : vector<1x1x32x32xf32> to vector<32x32xf32>
    %54 = vector.shape_cast %51 : vector<32x32xf32> to vector<1x1x32x32xf32>
    tpu.vector_store %arg5[%c0_56, %c6, %c0_57, %c0_58], %54 {strides = array<i32>} : memref<2x8x32x32xf32, #tpu.memory_space<vmem>>, vector<1x1x32x32xf32>,
    %c0_59 = arith.constant 0 : index
    %c224 = arith.constant 224 : index
    %55 = vector.load %arg7[%c0_59, %c224] : memref<66x256xf32, #tpu.memory_space<vmem>>, vector<32x32xf32>
    %c0_60 = arith.constant 0 : index
    %c7 = arith.constant 7 : index
    %c0_61 = arith.constant 0 : index
    %c0_62 = arith.constant 0 : index
    %56 = vector.load %arg5[%c0_60, %c7, %c0_61, %c0_62] : memref<2x8x32x32xf32, #tpu.memory_space<vmem>>, vector<1x1x32x32xf32>
    %57 = vector.shape_cast %56 : vector<1x1x32x32xf32> to vector<32x32xf32>
    %58 = vector.shape_cast %55 : vector<32x32xf32> to vector<1x1x32x32xf32>
    tpu.vector_store %arg5[%c0_60, %c7, %c0_61, %c0_62], %58 {strides = array<i32>} : memref<2x8x32x32xf32, #tpu.memory_space<vmem>>, vector<1x1x32x32xf32>,
    %c34 = arith.constant 34 : index
    %c0_63 = arith.constant 0 : index
    %59 = vector.load %arg7[%c34, %c0_63] : memref<66x256xf32, #tpu.memory_space<vmem>>, vector<32x32xf32>
    %c1_64 = arith.constant 1 : index
    %c0_65 = arith.constant 0 : index
    %c0_66 = arith.constant 0 : index
    %c0_67 = arith.constant 0 : index
    %60 = vector.load %arg5[%c1_64, %c0_65, %c0_66, %c0_67] : memref<2x8x32x32xf32, #tpu.memory_space<vmem>>, vector<1x1x32x32xf32>
    %61 = vector.shape_cast %60 : vector<1x1x32x32xf32> to vector<32x32xf32>
    %62 = vector.shape_cast %59 : vector<32x32xf32> to vector<1x1x32x32xf32>
    tpu.vector_store %arg5[%c1_64, %c0_65, %c0_66, %c0_67], %62 {strides = array<i32>} : memref<2x8x32x32xf32, #tpu.memory_space<vmem>>, vector<1x1x32x32xf32>,
    %c34_68 = arith.constant 34 : index
    %c32_69 = arith.constant 32 : index
    %63 = vector.load %arg7[%c34_68, %c32_69] : memref<66x256xf32, #tpu.memory_space<vmem>>, vector<32x32xf32>
    %c1_70 = arith.constant 1 : index
    %c1_71 = arith.constant 1 : index
    %c0_72 = arith.constant 0 : index
    %c0_73 = arith.constant 0 : index
    %64 = vector.load %arg5[%c1_70, %c1_71, %c0_72, %c0_73] : memref<2x8x32x32xf32, #tpu.memory_space<vmem>>, vector<1x1x32x32xf32>
    %65 = vector.shape_cast %64 : vector<1x1x32x32xf32> to vector<32x32xf32>
    %66 = vector.shape_cast %63 : vector<32x32xf32> to vector<1x1x32x32xf32>
    tpu.vector_store %arg5[%c1_70, %c1_71, %c0_72, %c0_73], %66 {strides = array<i32>} : memref<2x8x32x32xf32, #tpu.memory_space<vmem>>, vector<1x1x32x32xf32>,
    %c34_74 = arith.constant 34 : index
    %c64_75 = arith.constant 64 : index
    %67 = vector.load %arg7[%c34_74, %c64_75] : memref<66x256xf32, #tpu.memory_space<vmem>>, vector<32x32xf32>
    %c1_76 = arith.constant 1 : index
    %c2_77 = arith.constant 2 : index
    %c0_78 = arith.constant 0 : index
    %c0_79 = arith.constant 0 : index
    %68 = vector.load %arg5[%c1_76, %c2_77, %c0_78, %c0_79] : memref<2x8x32x32xf32, #tpu.memory_space<vmem>>, vector<1x1x32x32xf32>
    %69 = vector.shape_cast %68 : vector<1x1x32x32xf32> to vector<32x32xf32>
    %70 = vector.shape_cast %67 : vector<32x32xf32> to vector<1x1x32x32xf32>
    tpu.vector_store %arg5[%c1_76, %c2_77, %c0_78, %c0_79], %70 {strides = array<i32>} : memref<2x8x32x32xf32, #tpu.memory_space<vmem>>, vector<1x1x32x32xf32>,
    %c34_80 = arith.constant 34 : index
    %c96_81 = arith.constant 96 : index
    %71 = vector.load %arg7[%c34_80, %c96_81] : memref<66x256xf32, #tpu.memory_space<vmem>>, vector<32x32xf32>
    %c1_82 = arith.constant 1 : index
    %c3_83 = arith.constant 3 : index
    %c0_84 = arith.constant 0 : index
    %c0_85 = arith.constant 0 : index
    %72 = vector.load %arg5[%c1_82, %c3_83, %c0_84, %c0_85] : memref<2x8x32x32xf32, #tpu.memory_space<vmem>>, vector<1x1x32x32xf32>
    %73 = vector.shape_cast %72 : vector<1x1x32x32xf32> to vector<32x32xf32>
    %74 = vector.shape_cast %71 : vector<32x32xf32> to vector<1x1x32x32xf32>
    tpu.vector_store %arg5[%c1_82, %c3_83, %c0_84, %c0_85], %74 {strides = array<i32>} : memref<2x8x32x32xf32, #tpu.memory_space<vmem>>, vector<1x1x32x32xf32>,
    %c34_86 = arith.constant 34 : index
    %c128_87 = arith.constant 128 : index
    %75 = vector.load %arg7[%c34_86, %c128_87] : memref<66x256xf32, #tpu.memory_space<vmem>>, vector<32x32xf32>
    %c1_88 = arith.constant 1 : index
    %c4_89 = arith.constant 4 : index
    %c0_90 = arith.constant 0 : index
    %c0_91 = arith.constant 0 : index
    %76 = vector.load %arg5[%c1_88, %c4_89, %c0_90, %c0_91] : memref<2x8x32x32xf32, #tpu.memory_space<vmem>>, vector<1x1x32x32xf32>
    %77 = vector.shape_cast %76 : vector<1x1x32x32xf32> to vector<32x32xf32>
    %78 = vector.shape_cast %75 : vector<32x32xf32> to vector<1x1x32x32xf32>
    tpu.vector_store %arg5[%c1_88, %c4_89, %c0_90, %c0_91], %78 {strides = array<i32>} : memref<2x8x32x32xf32, #tpu.memory_space<vmem>>, vector<1x1x32x32xf32>,
    %c34_92 = arith.constant 34 : index
    %c160_93 = arith.constant 160 : index
    %79 = vector.load %arg7[%c34_92, %c160_93] : memref<66x256xf32, #tpu.memory_space<vmem>>, vector<32x32xf32>
    %c1_94 = arith.constant 1 : index
    %c5_95 = arith.constant 5 : index
    %c0_96 = arith.constant 0 : index
    %c0_97 = arith.constant 0 : index
    %80 = vector.load %arg5[%c1_94, %c5_95, %c0_96, %c0_97] : memref<2x8x32x32xf32, #tpu.memory_space<vmem>>, vector<1x1x32x32xf32>
    %81 = vector.shape_cast %80 : vector<1x1x32x32xf32> to vector<32x32xf32>
    %82 = vector.shape_cast %79 : vector<32x32xf32> to vector<1x1x32x32xf32>
    tpu.vector_store %arg5[%c1_94, %c5_95, %c0_96, %c0_97], %82 {strides = array<i32>} : memref<2x8x32x32xf32, #tpu.memory_space<vmem>>, vector<1x1x32x32xf32>,
    %c34_98 = arith.constant 34 : index
    %c192_99 = arith.constant 192 : index
    %83 = vector.load %arg7[%c34_98, %c192_99] : memref<66x256xf32, #tpu.memory_space<vmem>>, vector<32x32xf32>
    %c1_100 = arith.constant 1 : index
    %c6_101 = arith.constant 6 : index
    %c0_102 = arith.constant 0 : index
    %c0_103 = arith.constant 0 : index
    %84 = vector.load %arg5[%c1_100, %c6_101, %c0_102, %c0_103] : memref<2x8x32x32xf32, #tpu.memory_space<vmem>>, vector<1x1x32x32xf32>
    %85 = vector.shape_cast %84 : vector<1x1x32x32xf32> to vector<32x32xf32>
    %86 = vector.shape_cast %83 : vector<32x32xf32> to vector<1x1x32x32xf32>
    tpu.vector_store %arg5[%c1_100, %c6_101, %c0_102, %c0_103], %86 {strides = array<i32>} : memref<2x8x32x32xf32, #tpu.memory_space<vmem>>, vector<1x1x32x32xf32>,
    %c34_104 = arith.constant 34 : index
    %c224_105 = arith.constant 224 : index
    %87 = vector.load %arg7[%c34_104, %c224_105] : memref<66x256xf32, #tpu.memory_space<vmem>>, vector<32x32xf32>
    %c1_106 = arith.constant 1 : index
    %c7_107 = arith.constant 7 : index
    %c0_108 = arith.constant 0 : index
    %c0_109 = arith.constant 0 : index
    %88 = vector.load %arg5[%c1_106, %c7_107, %c0_108, %c0_109] : memref<2x8x32x32xf32, #tpu.memory_space<vmem>>, vector<1x1x32x32xf32>
    %89 = vector.shape_cast %88 : vector<1x1x32x32xf32> to vector<32x32xf32>
    %90 = vector.shape_cast %87 : vector<32x32xf32> to vector<1x1x32x32xf32>
    tpu.vector_store %arg5[%c1_106, %c7_107, %c0_108, %c0_109], %90 {strides = array<i32>} : memref<2x8x32x32xf32, #tpu.memory_space<vmem>>, vector<1x1x32x32xf32>,
    return
  }
  func.func @transform_0(%arg0: i32) -> (i32, i32) {
    %c0_i32 = arith.constant 0 : i32
    %c0_i32_0 = arith.constant 0 : i32
    %c0_i32_1 = arith.constant 0 : i32
    return %c0_i32, %c0_i32_0 : i32, i32
  }
  func.func @transform_1(%arg0: i32) -> (i32, i32) {
    %c0_i32 = arith.constant 0 : i32
    %c0_i32_0 = arith.constant 0 : i32
    %c0_i32_1 = arith.constant 0 : i32
    return %c0_i32, %c0_i32_0 : i32, i32
  }
  func.func @transform_2(%arg0: i32) -> (i32, i32, i32) {
    %c0_i32 = arith.constant 0 : i32
    %c0_i32_0 = arith.constant 0 : i32
    %c0_i32_1 = arith.constant 0 : i32
    %c0_i32_2 = arith.constant 0 : i32
    return %c0_i32, %c0_i32_0, %c0_i32_1 : i32, i32, i32
  }
  func.func @transform_3(%arg0: i32) -> (i32, i32) {
    %c0_i32 = arith.constant 0 : i32
    %c0_i32_0 = arith.constant 0 : i32
    %c0_i32_1 = arith.constant 0 : i32
    return %c0_i32, %c0_i32_0 : i32, i32
  }
  func.func @transform_4(%arg0: i32) -> (i32, i32, i32, i32) {
    %c0_i32 = arith.constant 0 : i32
    %c0_i32_0 = arith.constant 0 : i32
    %c0_i32_1 = arith.constant 0 : i32
    %c0_i32_2 = arith.constant 0 : i32
    %c0_i32_3 = arith.constant 0 : i32
    return %c0_i32, %c0_i32_0, %c0_i32_1, %c0_i32_2 : i32, i32, i32, i32
  }
}

</mosaic_0001>

<bundles_post_ra>
// kernel: tpu_custom_call.1
= control target key start
LH: loop header
LB: loop body
LE: loop exit
PB: predicated region body
PF: predicated region fallthrough
CT: control target
= control target key end

     0   :  { %9 = vsyncpa [#allocation5], 0  ;;  %s1779_s0 = inlined_call_operand.vmem [shape: bf16[32,64], index: 0, kind: input, shape index: {}]   ;;  %s1780_s1 = inlined_call_operand.vmem [shape: bf16[68,32], index: 1, kind: input, shape index: {}]   ;;  %s1781_s2 = inlined_call_operand.hbm [shape: bf16[3,64,256], index: 2, kind: input, shape index: {}]   ;;  %s1782_s3 = inlined_call_operand.vmem [shape: f32[1,256], index: 3, kind: input, shape index: {}]   ;;  %s1783_s4 = inlined_call_operand.hbm [shape: f32[2,8,32,32], index: 4, kind: output, shape index: {}]  }
   0x1   :  { %10 = vsyncpa [#allocation6], 0  ;;  %s19_s17 = sshll.u32 %s1781_s2, 4  ;;  %s1378_s18 = smov [#allocation4]   ;;  %s20_s17 = int_to_ptr.hbm [resolvable:$true] %s19_s17 }
   0x2   :  { %s21_s19 = sshll.u32 %s1378_s18, 4  ;;  %s1379_s20 = smov 128   ;;  %s22_s19 = int_to_ptr.vmem [resolvable:$true] %s21_s19 }
   0x3   :  { %s1380_s21 = smov 8  }
   0x4   :  { %27 = dma.hbm_to_vmem [thread:$0]  %s20_s17, 3072, %s22_s19, [#allocation5], %s1379_s20, %s1379_s20, %s1380_s21  }
   0x5   :  { %1374 = dma.done.wait [#allocation5], 3072  }
   0x6   :  { %1375 = vsyncadd [#allocation5], 4294964224  ;;  %v1274_v0 = vld [vmem:[%s1779_s0 + $0x8] sm:$0xff]  ;;  %v1273_v1 = vld [vmem:[%s1779_s0] sm:$0xff]  ;;  %vm83_vm0 = vcmask 261120   ;;  %vm141_vm1 = vcmask 519168  }
   0x7   :  { %105 = vmatpush.bf16.msra.mxu0 %v1274_v0  ;;  %1309 = vmatpush.bf16.msra.mxu1 %v1274_v0  ;;  %v1269_v2 = vld [vmem:[%s1780_s1] sm:$0xff]  ;;  %v1270_v3 = vld [vmem:[%s1780_s1 + $0x8] sm:$0xff]  ;;  %v1271_v7 = vld [vmem:[%s1780_s1 + $0x10] sm:$0xff]  ;;  %vm282_vm2 = vcmask 523264   ;;  %vm150_vm3 = vcmask 517120   ;;  %vm497_vm5 = vcmask 1046528  }
   0x8   :  { %v43_v4 = vld [vmem:[%s1780_s1 + $0x20] sm:$0x3]  ;;  %v1272_v8 = vld [vmem:[%s1780_s1 + $0x18] sm:$0xff]  ;;  %v1284_v9 = vld [vmem:[#allocation4 + $0x34] sm:$0xf]  ;;  %s1381_s9 = smov 32  }
   0x9   :  { %v65_v5 = vunpack.c.l.b16 %v43_v4  ;;  %v1213_v10 = vld [vmem:[#allocation4 + $0x38] sm:$0xf0]  ;;  %v1282_v12 = vld [vmem:[#allocation4 + $0x24] sm:$0xf]  ;;  %v1205_v13 = vld [vmem:[#allocation4 + $0x28] sm:$0xf0] }
   0xa   :  { %v1216_v11 = vor.u32 %v1284_v9, %v1213_v10  ;;  %v1208_v14 = vor.u32 %v1282_v12, %v1205_v13  ;;  %v1280_v15 = vld [vmem:[#allocation4 + $0x14] sm:$0xf]  ;;  %v1197_v16 = vld [vmem:[#allocation4 + $0x18] sm:$0xf0]  ;;  %v1278_v18 = vld [vmem:[#allocation4 + $0x4] sm:$0xf] }
   0xb   :  { %106 = vmatpush.bf16.msra.mxu0 %v1273_v1  ;;  %1310 = vmatpush.bf16.msra.mxu1 %v1273_v1  ;;  %v70_v6 = vpack.c.b16 %v65_v5, %v65_v5  ;;  %v1200_v17 = vor.u32 %v1280_v15, %v1197_v16  ;;  %v1189_v19 = vld [vmem:[#allocation4 + $0x8] sm:$0xf0]  ;;  %v1169_v21 = vld [vmem:[#allocation4 + $0x70] sm:$0xf]  ;;  %v1293_v22 = vld [vmem:[#allocation4 + $0x74] sm:$0xf0] }
   0xc   :  { %v1192_v20 = vor.u32 %v1278_v18, %v1189_v19  ;;  %v1170_v23 = vor.u32 %v1293_v22, %v1169_v21  ;;  %v1161_v24 = vld [vmem:[#allocation4 + $0x60] sm:$0xf]  ;;  %v1291_v25 = vld [vmem:[#allocation4 + $0x64] sm:$0xf0]  ;;  %v1153_v27 = vld [vmem:[#allocation4 + $0x50] sm:$0xf] }
   0xd   :  { %v1162_v26 = vor.u32 %v1291_v25, %v1161_v24  ;;  %v1289_v28 = vld [vmem:[#allocation4 + $0x54] sm:$0xf0]  ;;  %v1145_v32 = vld [vmem:[#allocation4 + $0x40] sm:$0xf]  ;;  %v1287_v33 = vld [vmem:[#allocation4 + $0x44] sm:$0xf0] }
   0xe   :  { %1126 = vmatmul.msk.bf16.vlgmr.msra.gmra.mxu0 %vm83_vm0, %v1269_v2  ;;  %1130 = vmatmul.msk.bf16.vlgmr.msra.gmra.mxu1 %vm83_vm0, %v70_v6  ;;  %v1154_v30 = vor.u32 %v1289_v28, %v1153_v27  ;;  %v1146_v34 = vor.u32 %v1287_v33, %v1145_v32  ;;  %v1292_v35 = vld [vmem:[#allocation4 + $0x74] sm:$0xf]  ;;  %v1171_v36 = vld [vmem:[#allocation4 + $0x78] sm:$0xf0]  ;;  %v1290_v40 = vld [vmem:[#allocation4 + $0x64] sm:$0xf] }
   0xf   :  { %455 = vmatpush.bf16.msrb.mxu0 %v1216_v11  ;;  %302 = vmatpush.bf16.msrb.mxu1 %v1170_v23  ;;  %v1174_v38 = vor.u32 %v1292_v35, %v1171_v36  ;;  %v1163_v41 = vld [vmem:[#allocation4 + $0x68] sm:$0xf0]  ;;  %v1288_v43 = vld [vmem:[#allocation4 + $0x54] sm:$0xf]  ;;  %v1155_v44 = vld [vmem:[#allocation4 + $0x58] sm:$0xf0] }
  0x10   :  { %1311 = vmatpush.bf16.msra.mxu3 %v1170_v23  ;;  %v1166_v42 = vor.u32 %v1290_v40, %v1163_v41  ;;  %v1158_v46 = vor.u32 %v1288_v43, %v1155_v44  ;;  %v1286_v49 = vld [vmem:[#allocation4 + $0x44] sm:$0xf]  ;;  %v1147_v50 = vld [vmem:[#allocation4 + $0x48] sm:$0xf0]  ;;  %v1300_v56 = vld [vmem:[#allocation4 + $0xb4] sm:$0xf] }
  0x11   :  { %1315 = vmatpush.bf16.msra.mxu2 %v1174_v38  ;;  %v1150_v52 = vor.u32 %v1286_v49, %v1147_v50  ;;  %v1255_v57 = vld [vmem:[#allocation4 + $0xb8] sm:$0xf0]  ;;  %v1211_v59 = vld [vmem:[#allocation4 + $0x30] sm:$0xf]  ;;  %v1285_v60 = vld [vmem:[#allocation4 + $0x34] sm:$0xf0] }
  0x12   :  { %v1258_v58 = vor.u32 %v1300_v56, %v1255_v57  ;;  %v1212_v63 = vor.u32 %v1285_v60, %v1211_v59  ;;  %v1253_v4 = vld [vmem:[#allocation4 + $0xb0] sm:$0xf]  ;;  %v1301_v5 = vld [vmem:[#allocation4 + $0xb4] sm:$0xf0]  ;;  %vm202_vm4 = vsmask.f32 7424 }
  0x13   :  { %456 = vmatpush.bf16.msrb.mxu0 %v1208_v14  ;;  %303 = vmatpush.bf16.msrb.mxu1 %v1162_v26  ;;  %v1254_v10 = vor.u32 %v1301_v5, %v1253_v4  ;;  %v1245_v11 = vld [vmem:[#allocation4 + $0xa0] sm:$0xf]  ;;  %v1299_v12 = vld [vmem:[#allocation4 + $0xa4] sm:$0xf0]  ;;  %v1237_v16 = vld [vmem:[#allocation4 + $0x90] sm:$0xf] }
  0x14   :  { %1312 = vmatpush.bf16.msra.mxu3 %v1162_v26  ;;  %v1298_v18 = vld [vmem:[#allocation4 + $0xa4] sm:$0xf]  ;;  %v1247_v19 = vld [vmem:[#allocation4 + $0xa8] sm:$0xf0]  ;;  %v1297_v21 = vld [vmem:[#allocation4 + $0x94] sm:$0xf0] }
  0x15   :  { %1316 = vmatpush.bf16.msra.mxu2 %v1166_v42  ;;  %v1250_v22 = vor.u32 %v1298_v18, %v1247_v19  ;;  %v1283_v23 = vld [vmem:[#allocation4 + $0x24] sm:$0xf0]  ;;  %v1238_v25 = vor.u32 %v1297_v21, %v1237_v16  ;;  %v1229_v26 = vld [vmem:[#allocation4 + $0x80] sm:$0xf]  ;;  %v1239_v40 = vld [vmem:[#allocation4 + $0x98] sm:$0xf0] }
  0x16   :  { %v1295_v27 = vld [vmem:[#allocation4 + $0x84] sm:$0xf0]  ;;  %v1195_v41 = vld [vmem:[#allocation4 + $0x10] sm:$0xf]  ;;  %v1281_v43 = vld [vmem:[#allocation4 + $0x14] sm:$0xf0] }
  0x17   :  { %457 = vmatpush.bf16.msrb.mxu0 %v1200_v17  ;;  %304 = vmatpush.bf16.msrb.mxu1 %v1154_v30  ;;  %v1246_v17 = vor.u32 %v1299_v12, %v1245_v11  ;;  %v1196_v44 = vor.u32 %v1281_v43, %v1195_v41  ;;  %s1383_s10 = smov 96   ;;  %vm879_vm6 = vcmask 261122   ;;  %vm884_vm7 = vcmask 254976   ;;  %s1384_s11 = smov [#allocation7]  }
  0x18   :  { %1313 = vmatpush.bf16.msra.mxu3 %v1154_v30  ;;  %s1087_s12 = sshll.u32 %s1384_s11, 4  ;;  %s1089_s15 = sshll.u32 %s1783_s4, 4  ;;  %s1088_s12 = int_to_ptr.vmem [resolvable:$true] %s1087_s12  ;;  %s1090_s15 = int_to_ptr.hbm [resolvable:$true] %s1089_s15 }
  0x19   :  { %1317 = vmatpush.bf16.msra.mxu2 %v1158_v46 }
  0x1b   :  { %458 = vmatpush.bf16.msrb.mxu0 %v1192_v20  ;;  %305 = vmatpush.bf16.msrb.mxu1 %v1146_v34  ;;  %v1203_v20 = vld [vmem:[#allocation4 + $0x20] sm:$0xf] }
  0x1c   :  { %1314 = vmatpush.bf16.msra.mxu3 %v1146_v34  ;;  %v1204_v24 = vor.u32 %v1283_v23, %v1203_v20 }
  0x1d   :  { %1318 = vmatpush.bf16.msra.mxu2 %v1150_v52 }
  0x1e   :  { %1127 = vmatmul.msk.bf16.gmra.mxu0 %vm83_vm0, %v1270_v3 }
  0x1f   :  { %335 = vmatpush.bf16.msra.mxu1 %v1174_v38 }
  0x20   :  { %422 = vmatpush.bf16.msrb.mxu3 %v1212_v63  ;;  %v1187_v63 = vld [vmem:[#allocation4] sm:$0xf] }
  0x21   :  { %599 = vmatpush.bf16.msrb.mxu2 %v1258_v58 }
  0x23   :  { %336 = vmatpush.bf16.msra.mxu1 %v1166_v42 }
  0x24   :  { %423 = vmatpush.bf16.msrb.mxu3 %v1204_v24 }
  0x25   :  { %600 = vmatpush.bf16.msrb.mxu2 %v1250_v22 }
  0x27   :  { %337 = vmatpush.bf16.msra.mxu1 %v1158_v46 }
  0x28   :  { %424 = vmatpush.bf16.msrb.mxu3 %v1196_v44 }
  0x2b   :  { %338 = vmatpush.bf16.msra.mxu1 %v1150_v52 }
  0x2e   :  { %1128 = vmatmul.msk.bf16.gmra.mxu0 %vm83_vm0, %v1271_v7 }
  0x3e   :  { %1129 = vmatmul.msk.bf16.gmra.mxu0 %vm83_vm0, %v1272_v8 }
  0x8b   :  { %v108_v29 = vpop.f32.mrf.mxu0  ;;  %v128_v51 = vpop.f32.mrf.mxu1 }
  0x8c   :  { %v132_v31 = vpack.c.bf16 %v108_v29, %v108_v29  ;;  %v140_v53 = vpack.c.bf16 %v128_v51, %v128_v51 }
  0x8e   :  { %142 = vst.msk [vmem:[#allocation2] sm:$0xf] %vm141_vm1, %v132_v31  ;;  %v1230_v31 = vor.u32 %v1295_v27, %v1229_v26 }
  0x8f   :  { %151 = vst.msk [vmem:[#allocation2 + $0x20] sm:$0x3] %vm150_vm3, %v140_v53 }
  0x93   :  { %v110_v37 = vpop.f32.mrf.mxu0  ;;  %v130_v61 = vpop.f32.mrf.mxu1 }
  0x94   :  { %v133_v39 = vpack.c.bf16 %v110_v37, %v110_v37  ;;  %v1294_v61 = vld [vmem:[#allocation4 + $0x84] sm:$0xf] }
  0x95   :  { %v1307_v46 = vld [vmem:[#allocation2] sm:$0xe] }
  0x96   :  { %143 = vst.msk [vmem:[#allocation2 + $0x4] sm:$0xf] %vm141_vm1, %v133_v39  ;;  %v1296_v39 = vld [vmem:[#allocation4 + $0x94] sm:$0xf]  ;;  %v169_v56 = vld [vmem:[#allocation2 + $0x20] sm:$0x3] }
  0x97   :  { %v1242_v42 = vor.u32 %v1296_v39, %v1239_v40  ;;  %v160_v59 = vld [vmem:[#allocation2 + $0x20] sm:$0x1]  ;;  %v196_v60 = vunpack.c.l.b16 %v169_v56 }
  0x99   :  { %601 = vmatpush.bf16.msrb.mxu2 %v1242_v42  ;;  %v201_v5 = vpack.c.b16 %v196_v60, %v196_v60 }
  0x9b   :  { %v113_v45 = vpop.f32.mrf.mxu0  ;;  %v505_v18 = vrot.slane %v201_v5, 1 }
  0x9c   :  { %v134_v47 = vpack.c.bf16 %v113_v45, %v113_v45 }
  0x9d   :  { %v1444_v48 = vld [vmem:[#allocation2] sm:$0xff]  }
  0x9e   :  { %144 = vst.msk [vmem:[#allocation2 + $0x8] sm:$0xf] %vm141_vm1, %v134_v47  ;;  %1222 = vmatmul.msk.bf16.vlgmr.msrb.gmra.mxu0 %vm282_vm2, %v1444_v48  ;;  %v206_v62 = vshll.u32 %v1444_v48, 16  ;;  %v204_v6 = vshrl.u32 %v1444_v48, 16  ;;  %v1306_v45 = vld [vmem:[#allocation2] sm:$0xf0] }
  0x9f   :  { %v1308_v49 = vor.u32 %v1307_v46, %v1306_v45 }
  0xa0   :  { %v208_v2 = vrot.slane %v206_v62, 1  ;;  %v1231_v62 = vld [vmem:[#allocation4 + $0x88] sm:$0xf0] }
  0xa2   :  { %v209_v8 = vor.u32 %v208_v2, %v204_v6  ;;  %v365_v2 = vunpack.c.l.b16 %v160_v59 }
  0xa3   :  { %v115_v54 = vpop.f32.mrf.mxu0 }
  0xa4   :  { %v135_v55 = vpack.c.bf16 %v115_v54, %v115_v54  ;;  %v366_v6 = vpack.c.b16 %v365_v2, %v365_v2 }
  0xa6   :  { %145 = vst.msk [vmem:[#allocation2 + $0xc] sm:$0xf] %vm141_vm1, %v135_v55  ;;  %v498_v55 = vrot.slane %v1308_v49, 1 }
  0xab   :  { %v118_v0 = vpop.f32.mrf.mxu0 }
  0xac   :  { %v136_v1 = vpack.c.bf16 %v118_v0, %v118_v0  ;;  %v1234_v0 = vor.u32 %v1294_v61, %v1231_v62 }
  0xad   :  { %v1451_v3 = vld [vmem:[#allocation2 + $0x8] sm:$0xff] }
  0xae   :  { %146 = vst.msk [vmem:[#allocation2 + $0x10] sm:$0xf] %vm141_vm1, %v136_v1  ;;  %1223 = vmatmul.msk.bf16.gmra.mxu0 %vm282_vm2, %v1451_v3  ;;  %v211_v7 = vshll.u32 %v1451_v3, 16  ;;  %v215_v32 = vshrl.u32 %v1451_v3, 16  ;;  %v499_v52 = vrot.slane %v1451_v3, 1  ;;  %602 = vmatpush.bf16.msrb.mxu2 %v1234_v0 }
  0xaf   :  { %v1279_v1 = vld [vmem:[#allocation4 + $0x4] sm:$0xf0] }
  0xb0   :  { %v213_v9 = vrot.slane %v211_v7, 1  ;;  %v500_v58 = vsel %vm497_vm5, %v498_v55, %v499_v52  ;;  %v1188_v4 = vor.u32 %v1279_v1, %v1187_v63  ;;  %v235_v7 = vshll.u32 %v201_v5, 16  ;;  %v646_v1 = vld [vmem:[%s1782_s3] sm:$0x3]  ;;  %s1382_s3 = smov 64  }
  0xb2   :  { %v214_v14 = vsel %vm202_vm4, %v209_v8, %v213_v9  ;;  %v217_v34 = vor.u32 %v215_v32, %v213_v9  ;;  %425 = vmatpush.bf16.msrb.mxu3 %v1188_v4  ;;  %v1547_v4 = vperm.slane %v646_v1, 1 }
  0xb3   :  { %v120_v13 = vpop.f32.mrf.mxu0  ;;  %1175 = vmatmul.msk.bf16.vlgmr.msrb.gmra.mxu1 %vm282_vm2, %v214_v14 }
  0xb4   :  { %v137_v15 = vpack.c.bf16 %v120_v13, %v120_v13  ;;  %566 = vmatpush.bf16.msrb.mxu1 %v1254_v10  ;;  %v237_v10 = vrot.slane %v235_v7, 1 }
  0xb6   :  { %147 = vst.msk [vmem:[#allocation2 + $0x14] sm:$0xf] %vm141_vm1, %v137_v15 }
  0xb8   :  { %567 = vmatpush.bf16.msrb.mxu1 %v1246_v17 }
  0xbb   :  { %v123_v28 = vpop.f32.mrf.mxu0 }
  0xbc   :  { %v138_v29 = vpack.c.bf16 %v123_v28, %v123_v28  ;;  %568 = vmatpush.bf16.msrb.mxu1 %v1238_v25 }
  0xbd   :  { %v1461_v30 = vld [vmem:[#allocation2 + $0x10] sm:$0xff] }
  0xbe   :  { %148 = vst.msk [vmem:[#allocation2 + $0x18] sm:$0xf] %vm141_vm1, %v138_v29  ;;  %1224 = vmatmul.msk.bf16.gmra.mxu0 %vm282_vm2, %v1461_v30  ;;  %v219_v33 = vshll.u32 %v1461_v30, 16  ;;  %v223_v50 = vshrl.u32 %v1461_v30, 16  ;;  %v501_v11 = vrot.slane %v1461_v30, 1 }
  0xc0   :  { %v221_v35 = vrot.slane %v219_v33, 1  ;;  %569 = vmatpush.bf16.msrb.mxu1 %v1230_v31  ;;  %v502_v13 = vsel %vm497_vm5, %v499_v52, %v501_v11 }
  0xc2   :  { %v222_v37 = vsel %vm202_vm4, %v217_v34, %v221_v35  ;;  %v225_v53 = vor.u32 %v223_v50, %v221_v35 }
  0xc3   :  { %v125_v36 = vpop.f32.mrf.mxu0  ;;  %1176 = vmatmul.msk.bf16.vlgmr.msra.gmra.mxu3 %vm282_vm2, %v222_v37  ;;  %1180 = vmatmul.msk.bf16.vlgmr.msra.gmra.mxu1 %vm282_vm2, %v214_v14  ;;  %v239_v14 = vshrl.u32 %v201_v5, 16 }
  0xc4   :  { %v139_v38 = vpack.c.bf16 %v125_v36, %v125_v36  ;;  %1181 = vmatmul.msk.bf16.vlgmr.msra.gmra.mxu2 %vm282_vm2, %v222_v37 }
  0xc5   :  { %v241_v16 = vor.u32 %v239_v14, %v237_v10 }
  0xc6   :  { %149 = vst.msk [vmem:[#allocation2 + $0x1c] sm:$0xf] %vm141_vm1, %v139_v38 }
  0xcd   :  { %v1277_v47 = vld [vmem:[#allocation2 + $0x18] sm:$0xff] }
  0xce   :  { %1225 = vmatmul.msk.bf16.gmra.mxu0 %vm282_vm2, %v1277_v47  ;;  %v227_v51 = vshll.u32 %v1277_v47, 16  ;;  %v231_v8 = vshrl.u32 %v1277_v47, 16  ;;  %v503_v15 = vrot.slane %v1277_v47, 1 }
  0xd0   :  { %v229_v54 = vrot.slane %v227_v51, 1  ;;  %v504_v17 = vsel %vm497_vm5, %v501_v11, %v503_v15  ;;  %v506_v19 = vsel %vm497_vm5, %v503_v15, %v505_v18 }
  0xd2   :  { %v230_v57 = vsel %vm202_vm4, %v225_v53, %v229_v54  ;;  %v233_v9 = vor.u32 %v231_v8, %v229_v54 }
  0xd3   :  { %1177 = vmatmul.msk.bf16.gmra.mxu3 %vm282_vm2, %v230_v57  ;;  %1259 = vmatmul.msk.bf16.vlgmr.msrb.gmra.mxu1 %vm282_vm2, %v500_v58 }
  0xd4   :  { %1182 = vmatmul.msk.bf16.gmra.mxu2 %vm282_vm2, %v230_v57  ;;  %v238_v12 = vsel %vm202_vm4, %v233_v9, %v237_v10 }
  0xde   :  { %1226 = vmatmul.msk.bf16.gmra.mxu0 %vm282_vm2, %v366_v6 }
  0xe3   :  { %1178 = vmatmul.msk.bf16.gmra.mxu3 %vm282_vm2, %v238_v12  ;;  %1260 = vmatmul.msk.bf16.gmra.mxu1 %vm282_vm2, %v502_v13 }
  0xe4   :  { %1183 = vmatmul.msk.bf16.gmra.mxu2 %vm282_vm2, %v238_v12 }
  0xf3   :  { %1179 = vmatmul.msk.bf16.gmra.mxu3 %vm282_vm2, %v241_v16  ;;  %1261 = vmatmul.msk.bf16.gmra.mxu1 %vm282_vm2, %v504_v17 }
  0xf4   :  { %1184 = vmatmul.msk.bf16.gmra.mxu2 %vm282_vm2, %v241_v16 }
 0x103   :  { %1217 = vmatmul.msk.bf16.vlgmr.msrb.gmra.mxu3 %vm282_vm2, %v1444_v48  ;;  %1262 = vmatmul.msk.bf16.gmra.mxu1 %vm282_vm2, %v506_v19 }
 0x104   :  { %1264 = vmatmul.msk.bf16.vlgmr.msrb.gmra.mxu2 %vm282_vm2, %v500_v58 }
 0x113   :  { %1218 = vmatmul.msk.bf16.gmra.mxu3 %vm282_vm2, %v1451_v3  ;;  %1263 = vmatmul.msk.bf16.gmra.mxu1 %vm282_vm2, %v505_v18 }
 0x114   :  { %1265 = vmatmul.msk.bf16.gmra.mxu2 %vm282_vm2, %v502_v13 }
 0x11b   :  { %v460_v20 = vpop.f32.mrf.mxu0 }
 0x123   :  { %v462_v21 = vpop.f32.mrf.mxu0  ;;  %1219 = vmatmul.msk.bf16.gmra.mxu3 %vm282_vm2, %v1461_v30 }
 0x124   :  { %1266 = vmatmul.msk.bf16.gmra.mxu2 %vm282_vm2, %v504_v17 }
 0x12b   :  { %v465_v22 = vpop.f32.mrf.mxu0 }
 0x130   :  { %v307_v48 = vpop.f32.mrf.mxu1 }
 0x133   :  { %1220 = vmatmul.msk.bf16.gmra.mxu3 %vm282_vm2, %v1277_v47  ;;  %v467_v23 = vpop.f32.mrf.mxu0 }
 0x134   :  { %1267 = vmatmul.msk.bf16.gmra.mxu2 %vm282_vm2, %v506_v19 }
 0x138   :  { %v309_v24 = vpop.f32.mrf.mxu1 }
 0x13b   :  { %v470_v3 = vpop.f32.mrf.mxu0 }
 0x140   :  { %v340_v25 = vpop.f32.mrf.mxu1 }
 0x141   :  { %v461_v26 = vadd.f32 %v460_v20, %v340_v25 }
 0x143   :  { %1221 = vmatmul.msk.bf16.gmra.mxu3 %vm282_vm2, %v366_v6  ;;  %v472_v27 = vpop.f32.mrf.mxu0  ;;  %v1549_v6 = vperm.slane %v646_v1, 0 }
 0x144   :  { %1268 = vmatmul.msk.bf16.gmra.mxu2 %vm282_vm2, %v505_v18 }
 0x146   :  { %v1508_v28 = vpop.f32.mrf.mxu3 }
 0x147   :  { %v345_v29 = vpop.f32.mrf.mxu2 }
 0x148   :  { %v1510_v30 = vadd.f32 %v465_v22, %v345_v29  ;;  %v342_v31 = vpop.f32.mrf.mxu1 }
 0x149   :  { %v463_v32 = vadd.f32 %v462_v21, %v342_v31 }
 0x14b   :  { %v475_v33 = vpop.f32.mrf.mxu0 }
 0x14e   :  { %v1512_v34 = vpop.f32.mrf.mxu3 }
 0x14f   :  { %v347_v35 = vpop.f32.mrf.mxu2 }
 0x150   :  { %v1514_v36 = vadd.f32 %v467_v23, %v347_v35  ;;  %v571_v37 = vpop.f32.mrf.mxu1 }
 0x153   :  { %v477_v38 = vpop.f32.mrf.mxu0 }
 0x156   :  { %v1516_v39 = vpop.f32.mrf.mxu3 }
 0x157   :  { %v350_v40 = vpop.f32.mrf.mxu2 }
 0x158   :  { %v1518_v41 = vadd.f32 %v470_v3, %v350_v40  ;;  %v573_v42 = vpop.f32.mrf.mxu1 }
 0x15b   :  { %v480_v43 = vpop.f32.mrf.mxu0 }
 0x15e   :  { %v1520_v44 = vpop.f32.mrf.mxu3 }
 0x15f   :  { %v352_v45 = vpop.f32.mrf.mxu2 }
 0x160   :  { %v1522_v46 = vadd.f32 %v472_v27, %v352_v45  ;;  %v576_v47 = vpop.f32.mrf.mxu1 }
 0x163   :  { %v482_v49 = vpop.f32.mrf.mxu0 }
 0x166   :  { %v1524_v50 = vpop.f32.mrf.mxu3 }
 0x167   :  { %v355_v51 = vpop.f32.mrf.mxu2 }
 0x168   :  { %v1526_v52 = vadd.f32 %v475_v33, %v355_v51  ;;  %v1528_v53 = vpop.f32.mrf.mxu1 }
 0x16e   :  { %v1530_v54 = vpop.f32.mrf.mxu3 }
 0x16f   :  { %v357_v55 = vpop.f32.mrf.mxu2 }
 0x170   :  { %v1532_v56 = vadd.f32 %v477_v38, %v357_v55  ;;  %v1534_v57 = vpop.f32.mrf.mxu1 }
 0x176   :  { %v1536_v58 = vpop.f32.mrf.mxu3 }
 0x177   :  { %v360_v59 = vpop.f32.mrf.mxu2 }
 0x178   :  { %v1538_v60 = vadd.f32 %v480_v43, %v360_v59  ;;  %v1540_v61 = vpop.f32.mrf.mxu1 }
 0x17e   :  { %v329_v62 = vpop.f32.mrf.mxu3 }
 0x17f   :  { %v362_v63 = vpop.f32.mrf.mxu2 }
 0x180   :  { %v1542_v0 = vpop.f32.mrf.mxu1 }
 0x186   :  { %v427_v2 = vpop.f32.mrf.mxu3 }
 0x187   :  { %v428_v5 = vadd.f32 %v427_v2, %v307_v48  ;;  %v604_v7 = vpop.f32.mrf.mxu2 }
 0x188   :  { %v629_v8 = vadd.f32 %v604_v7, %v461_v26  ;;  %v1551_v9 = vpop.f32.mrf.mxu1 }
 0x189   :  { %v628_v10 = vadd.f32 %v571_v37, %v428_v5 }
 0x18a   :  { %v653_v11 = vadd.f32 %v1547_v4, %v629_v8 }
 0x18b   :  { %v652_v12 = vadd.f32 %v1549_v6, %v628_v10 }
 0x18c   :  { %v671_v13 = vmax.f32 %v653_v11, 0.0 }
 0x18d   :  { %v670_v14 = vmax.f32 %v652_v12, 0.0 }
 0x18e   :  { %v429_v15 = vpop.f32.mrf.mxu3  ;;  %856 = vrot.lane.b32.xlu2 %v671_v13, %s1381_s9  ;;  %831 = vrot.lane.b32.xlu1 %v671_v13, %s1382_s3  ;;  %794 = vst.msk [vmem:[#allocation7 + $0x80] sm:$0xff] %vm83_vm0, %v671_v13 }
 0x18f   :  { %v430_v16 = vadd.f32 %v429_v15, %v309_v24  ;;  %v606_v17 = vpop.f32.mrf.mxu2  ;;  %806 = vrot.lane.b32.xlu0 %v671_v13, %s1383_s10  ;;  %710 = vst.msk [vmem:[#allocation7] sm:$0xff] %vm83_vm0, %v670_v14 }
 0x190   :  { %v631_v18 = vadd.f32 %v606_v17, %v463_v32  ;;  %v1559_v19 = vpop.f32.mrf.mxu1 }
 0x191   :  { %v630_v20 = vadd.f32 %v573_v42, %v430_v16 }
 0x192   :  { %v655_v21 = vadd.f32 %v1547_v4, %v631_v18 }
 0x193   :  { %v654_v22 = vadd.f32 %v1549_v6, %v630_v20 }
 0x194   :  { %v673_v48 = vmax.f32 %v655_v21, 0.0 }
 0x195   :  { %v672_v23 = vmax.f32 %v654_v22, 0.0 }
 0x196   :  { %v432_v3 = vpop.f32.mrf.mxu3  ;;  %808 = vrot.lane.b32.xlu1 %v673_v48, %s1383_s10  ;;  %747 = vrot.lane.b32.xlu2 %v670_v14, %s1382_s3  ;;  %795 = vst.msk [vmem:[#allocation7 + $0x88] sm:$0xff] %vm83_vm0, %v673_v48 }
 0x197   :  { %v433_v24 = vadd.f32 %v432_v3, %v1508_v28  ;;  %v609_v25 = vpop.f32.mrf.mxu2  ;;  %722 = vrot.lane.b32.xlu0 %v670_v14, %s1383_s10  ;;  %711 = vst.msk [vmem:[#allocation7 + $0x8] sm:$0xff] %vm83_vm0, %v672_v23 }
 0x198   :  { %v633_v26 = vadd.f32 %v609_v25, %v1510_v30  ;;  %v593_v27 = vpop.f32.mrf.mxu1 }
 0x199   :  { %v632_v29 = vadd.f32 %v576_v47, %v433_v24 }
 0x19a   :  { %v657_v31 = vadd.f32 %v1547_v4, %v633_v26 }
 0x19b   :  { %v656_v32 = vadd.f32 %v1549_v6, %v632_v29 }
 0x19c   :  { %v675_v33 = vmax.f32 %v657_v31, 0.0 }
 0x19d   :  { %v1573_v35 = vmax.f32 %v656_v32, 0.0 }
 0x19e   :  { %v434_v37 = vpop.f32.mrf.mxu3  ;;  %860 = vrot.lane.b32.xlu1 %v675_v33, %s1381_s9  ;;  %772 = vrot.lane.b32.xlu2 %v670_v14, %s1381_s9  ;;  %796 = vst.msk [vmem:[#allocation7 + $0x90] sm:$0xff] %vm83_vm0, %v675_v33 }
 0x19f   :  { %v435_v28 = vadd.f32 %v434_v37, %v1512_v34  ;;  %v611_v38 = vpop.f32.mrf.mxu2  ;;  %858 = vrot.lane.b32.xlu0 %v673_v48, %s1381_s9  ;;  %712 = vst.msk [vmem:[#allocation7 + $0x10] sm:$0xff] %vm83_vm0, %v1573_v35 }
 0x1a0   :  { %v635_v30 = vadd.f32 %v611_v38, %v1514_v36 }
 0x1a1   :  { %v634_v40 = vadd.f32 %v1528_v53, %v435_v28 }
 0x1a2   :  { %v659_v42 = vadd.f32 %v1547_v4, %v635_v30 }
 0x1a3   :  { %v658_v43 = vadd.f32 %v1549_v6, %v634_v40 }
 0x1a4   :  { %v1586_v45 = vmax.f32 %v659_v42, 0.0 }
 0x1a5   :  { %v1588_v47 = vmax.f32 %v658_v43, 0.0 }
 0x1a6   :  { %v437_v34 = vpop.f32.mrf.mxu3  ;;  %726 = vrot.lane.b32.xlu1 %v1573_v35, %s1383_s10  ;;  %833 = vrot.lane.b32.xlu2 %v673_v48, %s1382_s3  ;;  %797 = vst.msk [vmem:[#allocation7 + $0x98] sm:$0xff] %vm83_vm0, %v1586_v45 }
 0x1a7   :  { %v438_v36 = vadd.f32 %v437_v34, %v1516_v39  ;;  %v614_v49 = vpop.f32.mrf.mxu2  ;;  %724 = vrot.lane.b32.xlu0 %v672_v23, %s1383_s10  ;;  %713 = vst.msk [vmem:[#allocation7 + $0x18] sm:$0xff] %vm83_vm0, %v1588_v47 }
 0x1a8   :  { %v637_v51 = vadd.f32 %v614_v49, %v1518_v41 }
 0x1a9   :  { %v636_v53 = vadd.f32 %v1534_v57, %v438_v36 }
 0x1aa   :  { %v661_v55 = vadd.f32 %v1547_v4, %v637_v51 }
 0x1ab   :  { %v660_v59 = vadd.f32 %v1549_v6, %v636_v53 }
 0x1ac   :  { %v679_v62 = vmax.f32 %v661_v55, 0.0 }
 0x1ad   :  { %v678_v63 = vmax.f32 %v660_v59, 0.0 }
 0x1ae   :  { %697 = vst [vmem:[#allocation3 + $0x40] sm:$0xff] %v679_v62  ;;  %v439_v39 = vpop.f32.mrf.mxu3  ;;  %776 = vrot.lane.b32.xlu1 %v1573_v35, %s1381_s9  ;;  %749 = vrot.lane.b32.xlu2 %v672_v23, %s1382_s3 }
 0x1af   :  { %696 = vst [vmem:[#allocation3 + $0x88] sm:$0xff] %v678_v63  ;;  %v440_v41 = vadd.f32 %v439_v39, %v1520_v44  ;;  %v616_v1 = vpop.f32.mrf.mxu2  ;;  %774 = vrot.lane.b32.xlu0 %v672_v23, %s1381_s9 }
 0x1b0   :  { %v639_v57 = vadd.f32 %v616_v1, %v1522_v46 }
 0x1b1   :  { %v638_v2 = vadd.f32 %v1540_v61, %v440_v41 }
 0x1b2   :  { %v663_v5 = vadd.f32 %v1547_v4, %v639_v57 }
 0x1b3   :  { %v662_v7 = vadd.f32 %v1549_v6, %v638_v2 }
 0x1b4   :  { %v1612_v8 = vmax.f32 %v663_v5, 0.0 }
 0x1b5   :  { %v1614_v10 = vmax.f32 %v662_v7, 0.0  ;;  %v979_v13 = vld [vmem:[#allocation3 + $0x40] sm:$0xfc] }
 0x1b6   :  { %v442_v11 = vpop.f32.mrf.mxu3  ;;  %837 = vrot.lane.b32.xlu1 %v1586_v45, %s1382_s3  ;;  %810 = vrot.lane.b32.xlu2 %v675_v33, %s1383_s10  ;;  %v873_v61 = vld [vmem:[#allocation3 + $0x88] sm:$0xfc]  ;;  %986 = vst.msk [vmem:[#allocation7 + $0x186] sm:$0xff] %vm83_vm0, %v1612_v8  ;;  %v1052_v31 = vld [vmem:[#allocation3 + $0x40] sm:$0xfc] }
 0x1b7   :  { %v443_v44 = vadd.f32 %v442_v11, %v1524_v50  ;;  %v619_v12 = vpop.f32.mrf.mxu2  ;;  %835 = vrot.lane.b32.xlu0 %v675_v33, %s1382_s3  ;;  %881 = vst.msk [vmem:[#allocation7 + $0x106] sm:$0xff] %vm83_vm0, %v1614_v10  ;;  %v1021_v32 = vld [vmem:[#allocation3 + $0x40] sm:$0xfc]  ;;  %v917_v37 = vld [vmem:[#allocation3 + $0x88] sm:$0xfc] }
 0x1b8   :  { %v641_v46 = vadd.f32 %v619_v12, %v1526_v52  ;;  %880 = vst.msk [vmem:[#allocation7 + $0xfe] sm:$0xfc] %vm879_vm6, %v873_v61 }
 0x1b9   :  { %v640_v14 = vadd.f32 %v1542_v0, %v443_v44  ;;  %985 = vst.msk [vmem:[#allocation7 + $0x17e] sm:$0xfc] %vm879_vm6, %v979_v13 }
 0x1ba   :  { %v665_v15 = vadd.f32 %v1547_v4, %v641_v46 }
 0x1bb   :  { %v664_v50 = vadd.f32 %v1549_v6, %v640_v14 }
 0x1bc   :  { %v1631_v16 = vmax.f32 %v665_v15, 0.0 }
 0x1bd   :  { %v1633_v17 = vmax.f32 %v664_v50, 0.0 }
 0x1be   :  { %v444_v52 = vpop.f32.mrf.mxu3  ;;  %728 = vrot.lane.b32.xlu1 %v1588_v47, %s1383_s10  ;;  %862 = vrot.lane.b32.xlu2 %v1586_v45, %s1381_s9  ;;  %987 = vst.msk [vmem:[#allocation7 + $0x18e] sm:$0xff] %vm83_vm0, %v1631_v16 }
 0x1bf   :  { %v445_v0 = vadd.f32 %v444_v52, %v1530_v54  ;;  %v621_v18 = vpop.f32.mrf.mxu2  ;;  %751 = vrot.lane.b32.xlu0 %v1573_v35, %s1382_s3  ;;  %882 = vst.msk [vmem:[#allocation7 + $0x10e] sm:$0xff] %vm83_vm0, %v1633_v17 }
 0x1c0   :  { %v643_v20 = vadd.f32 %v621_v18, %v1532_v56 }
 0x1c1   :  { %v642_v21 = vadd.f32 %v1551_v9, %v445_v0 }
 0x1c2   :  { %v667_v22 = vadd.f32 %v1547_v4, %v643_v20 }
 0x1c3   :  { %v666_v48 = vadd.f32 %v1549_v6, %v642_v21 }
 0x1c4   :  { %v1650_v23 = vmax.f32 %v667_v22, 0.0 }
 0x1c5   :  { %v1652_v54 = vmax.f32 %v666_v48, 0.0 }
 0x1c6   :  { %v447_v3 = vpop.f32.mrf.mxu3  ;;  %753 = vrot.lane.b32.xlu1 %v1588_v47, %s1382_s3  ;;  %778 = vrot.lane.b32.xlu2 %v1588_v47, %s1381_s9  ;;  %988 = vst.msk [vmem:[#allocation7 + $0x196] sm:$0xff] %vm83_vm0, %v1650_v23 }
 0x1c7   :  { %v448_v56 = vadd.f32 %v447_v3, %v1536_v58  ;;  %v624_v24 = vpop.f32.mrf.mxu2  ;;  %812 = vrot.lane.b32.xlu0 %v1586_v45, %s1383_s10  ;;  %883 = vst.msk [vmem:[#allocation7 + $0x116] sm:$0xff] %vm83_vm0, %v1652_v54 }
 0x1c8   :  { %v645_v9 = vadd.f32 %v624_v24, %v1538_v60  ;;  %v990_v60 = vld [vmem:[#allocation3 + $0x40] sm:$0xfc] }
 0x1c9   :  { %v644_v25 = vadd.f32 %v1559_v19, %v448_v56  ;;  %v948_v19 = vld [vmem:[#allocation3 + $0x88] sm:$0xfc] }
 0x1ca   :  { %v669_v26 = vadd.f32 %v1547_v4, %v645_v9  ;;  %v886_v4 = vld [vmem:[#allocation3 + $0x88] sm:$0xfc] }
 0x1cb   :  { %v668_v27 = vadd.f32 %v1549_v6, %v644_v25 }
 0x1cc   :  { %v687_v29 = vmax.f32 %v669_v26, 0.0 }
 0x1cd   :  { %v686_v58 = vmax.f32 %v668_v27, 0.0 }
 0x1ce   :  { %705 = vst [vmem:[#allocation3 + $0x60] sm:$0x3] %v687_v29  ;;  %v449_v33 = vpop.f32.mrf.mxu3  ;;  %1062 = vrot.lane.b32.xlu1 %v1052_v31, %s1381_s9  ;;  %1031 = vrot.lane.b32.xlu2 %v1021_v32, %s1382_s3 }
 0x1cf   :  { %704 = vst [vmem:[#allocation3 + $0x68] sm:$0x3] %v686_v58  ;;  %v626_v35 = vpop.f32.mrf.mxu2  ;;  %1000 = vrot.lane.b32.xlu0 %v990_v60, %s1383_s10 }
 0x1d5   :  { %v983_v28 = vld [vmem:[#allocation3 + $0x60] sm:$0x3] }
 0x1d6   :  { %958 = vrot.lane.b32.xlu1 %v948_v19, %s1381_s9  ;;  %927 = vrot.lane.b32.xlu2 %v917_v37, %s1382_s3  ;;  %v877_v6 = vld [vmem:[#allocation3 + $0x68] sm:$0x3]  ;;  %989 = vst.msk [vmem:[#allocation7 + $0x19e] sm:$0x3] %vm884_vm7, %v983_v28  ;;  %v994_v47 = vld [vmem:[#allocation3 + $0x60] sm:$0x3] }
 0x1d7   :  { %896 = vrot.lane.b32.xlu0 %v886_v4, %s1383_s10  ;;  %885 = vst.msk [vmem:[#allocation7 + $0x11e] sm:$0x3] %vm884_vm7, %v877_v6  ;;  %v1025_v34 = vld [vmem:[#allocation3 + $0x60] sm:$0x3]  ;;  %v890_v53 = vld [vmem:[#allocation3 + $0x68] sm:$0x3] }
 0x1d8   :  { %v952_v55 = vld [vmem:[#allocation3 + $0x68] sm:$0x3]  ;;  %v1056_v41 = vld [vmem:[#allocation3 + $0x60] sm:$0x3] }
 0x1d9   :  { %v921_v59 = vld [vmem:[#allocation3 + $0x68] sm:$0x3] }
 0x1de   :  { %1002 = vrot.lane.b32.xlu1 %v1612_v8, %s1383_s10  ;;  %1064 = vrot.lane.b32.xlu2 %v1612_v8, %s1381_s9 }
 0x1df   :  { %1033 = vrot.lane.b32.xlu0 %v1612_v8, %s1382_s3 }
 0x1e6   :  { %898 = vrot.lane.b32.xlu1 %v1614_v10, %s1383_s10  ;;  %960 = vrot.lane.b32.xlu2 %v1614_v10, %s1381_s9 }
 0x1e7   :  { %929 = vrot.lane.b32.xlu0 %v1614_v10, %s1382_s3 }
 0x1e8   :  { %v857_v38 = vpop.permute.xlu2 %856 }
 0x1e9   :  { %869 = vst.msk [vmem:[#allocation7 + $0xe0] sm:$0xff] %vm83_vm0, %v857_v38 }
 0x1ee   :  { %1035 = vrot.lane.b32.xlu1 %v1631_v16, %s1382_s3  ;;  %1004 = vrot.lane.b32.xlu2 %v1631_v16, %s1383_s10 }
 0x1ef   :  { %962 = vrot.lane.b32.xlu0 %v1633_v17, %s1381_s9 }
 0x1f0   :  { %v748_v30 = vpop.permute.xlu2 %747 }
 0x1f1   :  { %760 = vst.msk [vmem:[#allocation7 + $0x40] sm:$0xff] %vm83_vm0, %v748_v30 }
 0x1f6   :  { %931 = vrot.lane.b32.xlu1 %v1633_v17, %s1382_s3  ;;  %900 = vrot.lane.b32.xlu2 %v1633_v17, %s1383_s10 }
 0x1f7   :  { %1006 = vrot.lane.b32.xlu0 %v1650_v23, %s1383_s10 }
 0x1f8   :  { %v773_v40 = vpop.permute.xlu2 %772 }
 0x1f9   :  { %785 = vst.msk [vmem:[#allocation7 + $0x60] sm:$0xff] %vm83_vm0, %v773_v40 }
 0x1fe   :  { %964 = vrot.lane.b32.xlu1 %v1652_v54, %s1381_s9  ;;  %1037 = vrot.lane.b32.xlu2 %v1650_v23, %s1382_s3 }
 0x1ff   :  { %902 = vrot.lane.b32.xlu0 %v1652_v54, %s1383_s10 }
 0x200   :  { %v832_v42 = vpop.permute.xlu1 %831  ;;  %v834_v43 = vpop.permute.xlu2 %833 }
 0x201   :  { %844 = vst.msk [vmem:[#allocation7 + $0xc0] sm:$0xff] %vm83_vm0, %v832_v42  ;;  %v807_v45 = vpop.permute.xlu0 %806 }
 0x202   :  { %819 = vst.msk [vmem:[#allocation7 + $0xa0] sm:$0xff] %vm83_vm0, %v807_v45 }
 0x203   :  { %845 = vst.msk [vmem:[#allocation7 + $0xc8] sm:$0xff] %vm83_vm0, %v834_v43 }
 0x206   :  { %1008 = vrot.lane.b32.xlu1 %v994_v47, %s1383_s10  ;;  %933 = vrot.lane.b32.xlu2 %v1652_v54, %s1382_s3 }
 0x207   :  { %1039 = vrot.lane.b32.xlu0 %v1025_v34, %s1382_s3 }
 0x208   :  { %v809_v36 = vpop.permute.xlu1 %808  ;;  %v750_v49 = vpop.permute.xlu2 %749 }
 0x209   :  { %820 = vst.msk [vmem:[#allocation7 + $0xa8] sm:$0xff] %vm83_vm0, %v809_v36  ;;  %v723_v51 = vpop.permute.xlu0 %722 }
 0x20a   :  { %761 = vst.msk [vmem:[#allocation7 + $0x48] sm:$0xff] %vm83_vm0, %v750_v49 }
 0x20b   :  { %735 = vst.msk [vmem:[#allocation7 + $0x20] sm:$0xff] %vm83_vm0, %v723_v51 }
 0x20e   :  { %904 = vrot.lane.b32.xlu1 %v890_v53, %s1383_s10  ;;  %966 = vrot.lane.b32.xlu2 %v952_v55, %s1381_s9 }
 0x20f   :  { %935 = vrot.lane.b32.xlu0 %v921_v59, %s1382_s3 }
 0x210   :  { %v861_v62 = vpop.permute.xlu1 %860  ;;  %v811_v63 = vpop.permute.xlu2 %810 }
 0x211   :  { %871 = vst.msk [vmem:[#allocation7 + $0xf0] sm:$0xff] %vm83_vm0, %v861_v62  ;;  %v859_v39 = vpop.permute.xlu0 %858 }
 0x212   :  { %821 = vst.msk [vmem:[#allocation7 + $0xb0] sm:$0xff] %vm83_vm0, %v811_v63 }
 0x213   :  { %870 = vst.msk [vmem:[#allocation7 + $0xe8] sm:$0xff] %vm83_vm0, %v859_v39 }
 0x216   :  { %1068 = vrot.lane.b32.xlu1 %v1650_v23, %s1381_s9  ;;  %1070 = vrot.lane.b32.xlu2 %v1056_v41, %s1381_s9 }
 0x217   :  { %1066 = vrot.lane.b32.xlu0 %v1631_v16, %s1381_s9 }
 0x218   :  { %v727_v1 = vpop.permute.xlu1 %726  ;;  %v863_v57 = vpop.permute.xlu2 %862 }
 0x219   :  { %737 = vst.msk [vmem:[#allocation7 + $0x30] sm:$0xff] %vm83_vm0, %v727_v1  ;;  %v725_v2 = vpop.permute.xlu0 %724 }
 0x21a   :  { %872 = vst.msk [vmem:[#allocation7 + $0xf8] sm:$0xff] %vm83_vm0, %v863_v57 }
 0x21b   :  { %736 = vst.msk [vmem:[#allocation7 + $0x28] sm:$0xff] %vm83_vm0, %v725_v2 }
 0x220   :  { %v777_v5 = vpop.permute.xlu1 %776  ;;  %v779_v7 = vpop.permute.xlu2 %778 }
 0x221   :  { %787 = vst.msk [vmem:[#allocation7 + $0x70] sm:$0xff] %vm83_vm0, %v777_v5  ;;  %v775_v8 = vpop.permute.xlu0 %774 }
 0x222   :  { %788 = vst.msk [vmem:[#allocation7 + $0x78] sm:$0xff] %vm83_vm0, %v779_v7 }
 0x223   :  { %786 = vst.msk [vmem:[#allocation7 + $0x68] sm:$0xff] %vm83_vm0, %v775_v8 }
 0x228   :  { %v838_v10 = vpop.permute.xlu1 %837  ;;  %v1032_v11 = vpop.permute.xlu2 %1031 }
 0x229   :  { %847 = vst.msk [vmem:[#allocation7 + $0xd8] sm:$0xff] %vm83_vm0, %v838_v10  ;;  %v836_v44 = vpop.permute.xlu0 %835 }
 0x22a   :  { %1047 = vst.msk [vmem:[#allocation7 + $0x1be] sm:$0xfc] %vm879_vm6, %v1032_v11 }
 0x22b   :  { %846 = vst.msk [vmem:[#allocation7 + $0xd0] sm:$0xff] %vm83_vm0, %v836_v44 }
 0x230   :  { %v729_v12 = vpop.permute.xlu1 %728  ;;  %v928_v46 = vpop.permute.xlu2 %927 }
 0x231   :  { %738 = vst.msk [vmem:[#allocation7 + $0x38] sm:$0xff] %vm83_vm0, %v729_v12  ;;  %v752_v61 = vpop.permute.xlu0 %751 }
 0x232   :  { %943 = vst.msk [vmem:[#allocation7 + $0x13e] sm:$0xfc] %vm879_vm6, %v928_v46 }
 0x233   :  { %762 = vst.msk [vmem:[#allocation7 + $0x50] sm:$0xff] %vm83_vm0, %v752_v61 }
 0x238   :  { %v754_v13 = vpop.permute.xlu1 %753  ;;  %v1065_v14 = vpop.permute.xlu2 %1064 }
 0x239   :  { %763 = vst.msk [vmem:[#allocation7 + $0x58] sm:$0xff] %vm83_vm0, %v754_v13  ;;  %v813_v15 = vpop.permute.xlu0 %812 }
 0x23a   :  { %1079 = vst.msk [vmem:[#allocation7 + $0x1e6] sm:$0xff] %vm83_vm0, %v1065_v14 }
 0x23b   :  { %822 = vst.msk [vmem:[#allocation7 + $0xb8] sm:$0xff] %vm83_vm0, %v813_v15 }
 0x240   :  { %v1063_v50 = vpop.permute.xlu1 %1062  ;;  %v961_v16 = vpop.permute.xlu2 %960 }
 0x241   :  { %1078 = vst.msk [vmem:[#allocation7 + $0x1de] sm:$0xfc] %vm879_vm6, %v1063_v50  ;;  %v1001_v17 = vpop.permute.xlu0 %1000 }
 0x242   :  { %975 = vst.msk [vmem:[#allocation7 + $0x166] sm:$0xff] %vm83_vm0, %v961_v16 }
 0x243   :  { %1016 = vst.msk [vmem:[#allocation7 + $0x19e] sm:$0xfc] %vm879_vm6, %v1001_v17 }
 0x248   :  { %v959_v52 = vpop.permute.xlu1 %958  ;;  %v1005_v0 = vpop.permute.xlu2 %1004 }
 0x249   :  { %974 = vst.msk [vmem:[#allocation7 + $0x15e] sm:$0xfc] %vm879_vm6, %v959_v52  ;;  %v897_v18 = vpop.permute.xlu0 %896 }
 0x24a   :  { %1018 = vst.msk [vmem:[#allocation7 + $0x1ae] sm:$0xff] %vm83_vm0, %v1005_v0 }
 0x24b   :  { %912 = vst.msk [vmem:[#allocation7 + $0x11e] sm:$0xfc] %vm879_vm6, %v897_v18 }
 0x250   :  { %v1003_v20 = vpop.permute.xlu1 %1002  ;;  %v901_v21 = vpop.permute.xlu2 %900 }
 0x251   :  { %1017 = vst.msk [vmem:[#allocation7 + $0x1a6] sm:$0xff] %vm83_vm0, %v1003_v20  ;;  %v1034_v22 = vpop.permute.xlu0 %1033 }
 0x252   :  { %914 = vst.msk [vmem:[#allocation7 + $0x12e] sm:$0xff] %vm83_vm0, %v901_v21 }
 0x253   :  { %1048 = vst.msk [vmem:[#allocation7 + $0x1c6] sm:$0xff] %vm83_vm0, %v1034_v22 }
 0x258   :  { %v899_v48 = vpop.permute.xlu1 %898  ;;  %v1038_v23 = vpop.permute.xlu2 %1037 }
 0x259   :  { %913 = vst.msk [vmem:[#allocation7 + $0x126] sm:$0xff] %vm83_vm0, %v899_v48  ;;  %v930_v54 = vpop.permute.xlu0 %929 }
 0x25a   :  { %1050 = vst.msk [vmem:[#allocation7 + $0x1d6] sm:$0xff] %vm83_vm0, %v1038_v23 }
 0x25b   :  { %944 = vst.msk [vmem:[#allocation7 + $0x146] sm:$0xff] %vm83_vm0, %v930_v54 }
 0x260   :  { %v1036_v3 = vpop.permute.xlu1 %1035  ;;  %v934_v56 = vpop.permute.xlu2 %933 }
 0x261   :  { %1049 = vst.msk [vmem:[#allocation7 + $0x1ce] sm:$0xff] %vm83_vm0, %v1036_v3  ;;  %v963_v24 = vpop.permute.xlu0 %962 }
 0x262   :  { %946 = vst.msk [vmem:[#allocation7 + $0x156] sm:$0xff] %vm83_vm0, %v934_v56 }
 0x263   :  { %976 = vst.msk [vmem:[#allocation7 + $0x16e] sm:$0xff] %vm83_vm0, %v963_v24 }
 0x268   :  { %v932_v9 = vpop.permute.xlu1 %931  ;;  %v967_v25 = vpop.permute.xlu2 %966 }
 0x269   :  { %945 = vst.msk [vmem:[#allocation7 + $0x14e] sm:$0xff] %vm83_vm0, %v932_v9  ;;  %v1007_v26 = vpop.permute.xlu0 %1006 }
 0x26a   :  { %978 = vst.msk [vmem:[#allocation7 + $0x17e] sm:$0x3] %vm884_vm7, %v967_v25 }
 0x26b   :  { %1019 = vst.msk [vmem:[#allocation7 + $0x1b6] sm:$0xff] %vm83_vm0, %v1007_v26 }
 0x270   :  { %v965_v27 = vpop.permute.xlu1 %964  ;;  %v1071_v29 = vpop.permute.xlu2 %1070 }
 0x271   :  { %977 = vst.msk [vmem:[#allocation7 + $0x176] sm:$0xff] %vm83_vm0, %v965_v27  ;;  %v903_v58 = vpop.permute.xlu0 %902 }
 0x272   :  { %1082 = vst.msk [vmem:[#allocation7 + $0x1fe] sm:$0x3] %vm884_vm7, %v1071_v29 }
 0x273   :  { %915 = vst.msk [vmem:[#allocation7 + $0x136] sm:$0xff] %vm83_vm0, %v903_v58 }
 0x278   :  { %v1009_v31 = vpop.permute.xlu1 %1008 }
 0x279   :  { %1020 = vst.msk [vmem:[#allocation7 + $0x1be] sm:$0x3] %vm884_vm7, %v1009_v31  ;;  %v1040_v32 = vpop.permute.xlu0 %1039 }
 0x27a   :  { %1051 = vst.msk [vmem:[#allocation7 + $0x1de] sm:$0x3] %vm884_vm7, %v1040_v32 }
 0x280   :  { %v905_v33 = vpop.permute.xlu1 %904 }
 0x281   :  { %916 = vst.msk [vmem:[#allocation7 + $0x13e] sm:$0x3] %vm884_vm7, %v905_v33  ;;  %v936_v60 = vpop.permute.xlu0 %935 }
 0x282   :  { %947 = vst.msk [vmem:[#allocation7 + $0x15e] sm:$0x3] %vm884_vm7, %v936_v60 }
 0x288   :  { %v1069_v35 = vpop.permute.xlu1 %1068 }
 0x289   :  { %1081 = vst.msk [vmem:[#allocation7 + $0x1f6] sm:$0xff] %vm83_vm0, %v1069_v35  ;;  %v1067_v19 = vpop.permute.xlu0 %1066 }
 0x28a   :  { %1080 = vst.msk [vmem:[#allocation7 + $0x1ee] sm:$0xff] %vm83_vm0, %v1067_v19 }
 0x28b   :  { %1095 = dma.vmem_to_hbm [thread:$0]  %s1088_s12, 8192, %s1090_s15, [#allocation6], %s1379_s20, %s1379_s20, %s1380_s21  }
 0x28c   :  { %1376 = dma.done.wait [#allocation6], 8192  }
 0x28d   :  { %1377 = vsyncadd [#allocation6], 4294959104 }
 0x28e   :  { %1100 = vsyncpa [#allocation5], 1 }
 0x28f   :  { %1101 = vsyncpa [#allocation6], 1 }

</bundles_post_ra>
